<compile_context>
chip_gen: v7x
topology: tpu7x:2x2x1
jax: 0.10.0
libtpu: 0.0.40
codegen_flags: <defaults>
</compile_context>

<pallas_src>
import functools

import jax
import jax.numpy as jnp
from jax import lax
from jax.experimental import pallas as pl
from jax.experimental.pallas import tpu as pltpu


# dot_general dimension numbers contracting both minor dims (Q @ K^T pattern).
_NT_DIMS = (((1,), (1,)), ((), ()))


def _cdiv(a, b):
    return -(-a // b)


def _focal_loss_kernel(logits_ref, targets_ref, alpha_ref, out_ref, *,
                       gamma: float, n_total: int, tile_n: int,
                       tiles_per_part: int, needs_mask: bool):
    p = pl.program_id(0)   # core-parallel partition (v7x: one per TensorCore)
    t = pl.program_id(1)   # batch tile within the partition (reduction axis)

    # Per-partition partial sum accumulates directly in the resident out block.
    @pl.when(t == 0)
    def _init():
        out_ref[...] = jnp.zeros_like(out_ref)

    x_nc = logits_ref[...]                      # (TILE_N, C), native dtype, sample-major
    c = x_nc.shape[1]

    # ---- In-kernel transpose to class-major (C, TILE_N) via MXU identity matmul.
    # Batch lands on the 128-wide lane axis -> exp/VPU work is lane-dense.
    eye = (lax.broadcasted_iota(jnp.int32, (c, c), 0) ==
           lax.broadcasted_iota(jnp.int32, (c, c), 1))
    if x_nc.dtype == jnp.bfloat16:
        # bf16 * {0,1} summed in f32 is exact.
        x = lax.dot_general(eye.astype(jnp.bfloat16), x_nc, _NT_DIMS,
                            preferred_element_type=jnp.float32)
    else:
        # f32 (or other) logits: exact-ish hi/lo bf16 split (error ~2^-18 rel),
        # independent of MXU precision flags.
        x32 = x_nc.astype(jnp.float32)
        hi = x32.astype(jnp.bfloat16)
        lo = (x32 - hi.astype(jnp.float32)).astype(jnp.bfloat16)
        eye16 = eye.astype(jnp.bfloat16)
        x = (lax.dot_general(eye16, hi, _NT_DIMS, preferred_element_type=jnp.float32)
             + lax.dot_general(eye16, lo, _NT_DIMS, preferred_element_type=jnp.float32))
    # x: (C, TILE_N) float32

    tgt = targets_ref[...]                      # (1, TILE_N) int32 class ids
    a = alpha_ref[...].astype(jnp.float32)      # (C, 1) per-class alpha

    # One-hot mask over the class (sublane) axis.
    cls_ids = lax.broadcasted_iota(jnp.int32, x.shape, 0)      # (C, TILE_N)
    onehot = cls_ids == tgt                                     # (C, TILE_N)

    # Gathered log-softmax over classes (no full softmax divide, no log of a
    # possibly-underflowed probability).
    m = jnp.max(x, axis=0, keepdims=True)                            # (1, TILE_N)
    lse = jnp.log(jnp.sum(jnp.exp(x - m), axis=0, keepdims=True))    # (1, TILE_N)
    x_t = jnp.sum(jnp.where(onehot, x, 0.0), axis=0, keepdims=True)  # (1, TILE_N)
    a_t = jnp.sum(jnp.where(onehot, a, 0.0), axis=0, keepdims=True)  # (1, TILE_N)

    log_p = x_t - m - lse
    prob = jnp.exp(log_p)
    # Clamp: prob can exceed 1.0 by an ulp -> keep the power's base non-negative.
    one_minus = jnp.maximum(1.0 - prob, 0.0)

    g = float(gamma)
    if g.is_integer() and 0.0 <= g <= 8.0:
        gi = int(g)
        focal = one_minus if gi >= 1 else jnp.ones_like(one_minus)
        for _ in range(gi - 1):                 # gamma=2 -> one multiply (squaring)
            focal = focal * one_minus
    else:
        focal = jnp.power(one_minus, jnp.float32(g))

    per_sample = -(a_t * focal * log_p)                              # (1, TILE_N)

    if needs_mask:
        # Mask padded batch columns of ragged / duplicated (clamped) tiles.
        col = ((p * tiles_per_part + t) * tile_n
               + lax.broadcasted_iota(jnp.int32, per_sample.shape, 1))
        per_sample = jnp.where(col < n_total, per_sample, 0.0)

    out_ref[...] += jnp.sum(per_sample)          # scalar broadcast into (1, 128)


def focal_loss(logits, targets, alpha, *, gamma=2.0, size_average=True,
               tile_n=None):
    """logits: (N, C) float (any dtype), targets: (N,) int, alpha: (C,) float
    -> scalar f32 focal loss matching PyTorch FocalLoss.forward."""
    N, C = logits.shape

    targets_2d = targets.reshape(1, N).astype(jnp.int32)   # (1, N): lane-dense, tiny
    alpha_2d = jnp.asarray(alpha, dtype=jnp.float32).reshape(C, 1)

    # Dtype-adaptive default tile: the (TILE_N, C) input window is lane-padded
    # C->128 in VMEM, so f32 tiles cost 512 B/row (bf16: 256 B/row) per buffer.
    if tile_n is None:
        tile_n = 16384 if logits.dtype.itemsize <= 2 else 8192

    if N <= tile_n:
        tn = N                       # single full-extent tile
    else:
        assert tile_n % 128 == 0, "tile_n must be a multiple of 128"
        tn = tile_n

    num_tiles = _cdiv(N, tn)
    num_parts = 2 if num_tiles >= 2 else 1          # v7x: one partition per TC
    tpp = _cdiv(num_tiles, num_parts)               # tiles per partition
    # Mask only if there are padded columns anywhere (ragged last tile or
    # clamped duplicate tiles from the partition split).
    needs_mask = (num_parts * tpp * tn) != N

    def tile_idx(pi, ti):
        # Clamp so duplicated trailing slots re-read the last tile; their
        # contribution is zeroed by the column mask.
        return jnp.minimum(pi * tpp + ti, num_tiles - 1)

    kernel = functools.partial(
        _focal_loss_kernel,
        gamma=float(gamma), n_total=N, tile_n=tn,
        tiles_per_part=tpp, needs_mask=bool(needs_mask))

    partials = pl.pallas_call(
        kernel,
        out_shape=jax.ShapeDtypeStruct((1, num_parts * 128), jnp.float32),
        grid_spec=pltpu.PrefetchScalarGridSpec(
            num_scalar_prefetch=0,
            grid=(num_parts, tpp),
            in_specs=[
                # logits stay (N, C): one contiguous DMA per tile, no HBM transpose.
                pl.BlockSpec((tn, C), lambda pi, ti: (tile_idx(pi, ti), 0)),
                pl.BlockSpec((1, tn), lambda pi, ti: (0, tile_idx(pi, ti))),
                pl.BlockSpec((C, 1), lambda pi, ti: (0, 0)),          # alpha, pinned
            ],
            # One resident (1, 128) partial-sum block per partition.
            out_specs=pl.BlockSpec((1, 128), lambda pi, ti: (0, pi)),
        ),
        compiler_params=pltpu.CompilerParams(
            dimension_semantics=("parallel", "arbitrary"),
            # Worst-case usage (f32, tn=8192 / bf16, tn=16384) is ~20-25 MiB;
            # 40 MiB leaves headroom and stays under v7x's 64 MiB physical VMEM.
            vmem_limit_bytes=40 * 1024 * 1024,
        ),
    )(logits, targets_2d, alpha_2d)

    total = jnp.sum(partials.reshape(num_parts, 128)[:, 0])
    if size_average:
        total = total * jnp.float32(1.0 / N)
    return total


def focal_loss_ref(logits, targets, alpha, *, gamma=2.0, size_average=True):
    """Pure-JAX reference mirroring the PyTorch forward exactly."""
    p = jax.nn.softmax(logits.astype(jnp.float32), axis=1)
    probs = jnp.take_along_axis(p, targets[:, None], axis=1)      # (N, 1)
    alpha_per = jnp.asarray(alpha, dtype=jnp.float32)[targets][:, None]
    batch_loss = -alpha_per * jnp.power(1.0 - probs, gamma) * jnp.log(probs)
    return jnp.mean(batch_loss) if size_average else jnp.sum(batch_loss)


if __name__ == "__main__":
    gamma = 2.0
    C = 16
    alpha = jnp.full((C,), 0.25, dtype=jnp.float32)   # module default alpha=0.25

    key = jax.random.PRNGKey(0)
    k1, k2, k3, k4, k5, k6 = jax.random.split(key, 6)

    # Test 1: tiny single-tile case, f32 logits, size_average=True (mean).
    N1 = 8
    logits1 = jax.random.normal(k1, (N1, C), dtype=jnp.float32)
    targets1 = jax.random.randint(k2, (N1,), 0, C, dtype=jnp.int32)
    loss1 = focal_loss(logits1, targets1, alpha, gamma=gamma, size_average=True)
    loss1 = jax.block_until_ready(loss1)
    ref1 = focal_loss_ref(logits1, targets1, alpha, gamma=gamma, size_average=True)
    assert jnp.allclose(loss1, ref1, rtol=1e-4, atol=1e-6), (loss1, ref1)

    # Test 2: multi-tile ragged batch, bf16 logits, dual-partition grid with a
    # clamped duplicate tile, size_average=False (sum).
    N2 = 300
    logits2 = jax.random.normal(k3, (N2, C), dtype=jnp.float32).astype(jnp.bfloat16)
    targets2 = jax.random.randint(k4, (N2,), 0, C, dtype=jnp.int32)
    loss2 = focal_loss(logits2, targets2, alpha, gamma=gamma,
                       size_average=False, tile_n=128)
    loss2 = jax.block_until_ready(loss2)
    ref2 = focal_loss_ref(logits2, targets2, alpha, gamma=gamma, size_average=False)
    assert jnp.allclose(loss2, ref2, rtol=1e-4, atol=1e-4), (loss2, ref2)

    # Test 3: multi-tile f32 path (hi/lo split transpose) + ragged mask + mean.
    N3 = 1000
    logits3 = jax.random.normal(k5, (N3, C), dtype=jnp.float32) * 3.0
    targets3 = jax.random.randint(k6, (N3,), 0, C, dtype=jnp.int32)
    loss3 = focal_loss(logits3, targets3, alpha, gamma=gamma,
                       size_average=True, tile_n=256)
    loss3 = jax.block_until_ready(loss3)
    ref3 = focal_loss_ref(logits3, targets3, alpha, gamma=gamma, size_average=True)
    assert jnp.allclose(loss3, ref3, rtol=1e-4, atol=1e-5), (loss3, ref3)

    print("KERNEL_OK")
</pallas_src>

<mosaic_0001>
module attributes {stable_mosaic.version = 11 : i64} {
  func.func @_focal_loss_kernel(%arg0: i32, %arg1: i32, %arg2: memref<8x16xf32, #tpu.memory_space<vmem>>, %arg3: memref<1x8xi32, #tpu.memory_space<vmem>>, %arg4: memref<16x1xf32, #tpu.memory_space<vmem>>, %arg5: memref<1x128xf32, #tpu.memory_space<vmem>>) attributes {dimension_semantics = [#tpu.dimension_semantics<parallel>, #tpu.dimension_semantics<arbitrary>], iteration_bounds = array<i64: 1, 1>, scalar_prefetch = 0 : i64, scratch_operands = 0 : i64, tpu.core_type = #tpu.core_type<tc>, window_params = [{transform_indices = @transform_0, window_bounds = array<i64: 8, 16>}, {transform_indices = @transform_1, window_bounds = array<i64: 1, 8>}, {pipeline_mode = #tpu.pipeline_mode<synchronous>, transform_indices = @transform_2, window_bounds = array<i64: 16, 1>}, {transform_indices = @transform_3, window_bounds = array<i64: 1, 128>}]} {
    %c0_i32 = arith.constant 0 : i32
    %0 = arith.cmpi eq, %arg1, %c0_i32 : i32
    %1 = arith.extui %0 : i1 to i32
    %c0_i32_0 = arith.constant 0 : i32
    %2 = arith.cmpi ne, %1, %c0_i32_0 : i32
    scf.if %2 {
      %cst_21 = arith.constant 0.000000e+00 : f32
      %60 = vector.broadcast %cst_21 : f32 to vector<1x128xf32>
      %c0_22 = arith.constant 0 : index
      %c0_23 = arith.constant 0 : index
      %61 = vector.load %arg5[%c0_22, %c0_23] : memref<1x128xf32, #tpu.memory_space<vmem>>, vector<1x128xf32>
      tpu.vector_store %arg5[%c0_22, %c0_23], %60 {strides = array<i32>} : memref<1x128xf32, #tpu.memory_space<vmem>>, vector<1x128xf32>,
    } else {
    }
    %c0 = arith.constant 0 : index
    %c0_1 = arith.constant 0 : index
    %3 = vector.load %arg2[%c0, %c0_1] : memref<8x16xf32, #tpu.memory_space<vmem>>, vector<8x16xf32>
    %4 = tpu.iota {dimensions = array<i32: 0>} : vector<16x16xi32>
    %5 = tpu.iota {dimensions = array<i32: 1>} : vector<16x16xi32>
    %6 = arith.cmpi eq, %4, %5 : vector<16x16xi32>
    %7 = arith.truncf %3 : vector<8x16xf32> to vector<8x16xbf16>
    %8 = arith.extf %7 : vector<8x16xbf16> to vector<8x16xf32>
    %9 = arith.subf %3, %8 : vector<8x16xf32>
    %10 = arith.truncf %9 : vector<8x16xf32> to vector<8x16xbf16>
    %11 = arith.extui %6 : vector<16x16xi1> to vector<16x16xi32>
    %12 = arith.sitofp %11 : vector<16x16xi32> to vector<16x16xf32>
    %13 = arith.truncf %12 : vector<16x16xf32> to vector<16x16xbf16>
    %cst = arith.constant dense<0.000000e+00> : vector<16x8xf32>
    %14 = tpu.matmul %13, %7, %cst {dimension_numbers = #tpu.dot_dimension_numbers<[1], [1], [0], [0], [0, 0, 1, 0], [], []>} : vector<16x16xbf16>, vector<8x16xbf16>, vector<16x8xf32> -> vector<16x8xf32>
    %cst_2 = arith.constant dense<0.000000e+00> : vector<16x8xf32>
    %15 = tpu.matmul %13, %10, %cst_2 {dimension_numbers = #tpu.dot_dimension_numbers<[1], [1], [0], [0], [0, 0, 1, 0], [], []>} : vector<16x16xbf16>, vector<8x16xbf16>, vector<16x8xf32> -> vector<16x8xf32>
    %16 = arith.addf %14, %15 : vector<16x8xf32>
    %c0_3 = arith.constant 0 : index
    %c0_4 = arith.constant 0 : index
    %17 = vector.load %arg3[%c0_3, %c0_4] : memref<1x8xi32, #tpu.memory_space<vmem>>, vector<1x8xi32>
    %c0_5 = arith.constant 0 : index
    %c0_6 = arith.constant 0 : index
    %18 = vector.load %arg4[%c0_5, %c0_6] : memref<16x1xf32, #tpu.memory_space<vmem>>, vector<16x1xf32>
    %19 = tpu.iota {dimensions = array<i32: 0>} : vector<16x8xi32>
    %20 = vector.broadcast %17 : vector<1x8xi32> to vector<16x8xi32>
    %21 = arith.cmpi eq, %19, %20 : vector<16x8xi32>
    %cst_7 = arith.constant dense<0xFF800000> : vector<8xf32>
    %22 = vector.multi_reduction <maximumf>, %16, %cst_7 [0] : vector<16x8xf32> to vector<8xf32>
    %23 = vector.shape_cast %22 : vector<8xf32> to vector<1x8xf32>
    %24 = vector.broadcast %23 : vector<1x8xf32> to vector<16x8xf32>
    %25 = arith.subf %16, %24 : vector<16x8xf32>
    %26 = math.exp %25 : vector<16x8xf32>
    %cst_8 = arith.constant dense<0.000000e+00> : vector<8xf32>
    %27 = vector.multi_reduction <add>, %26, %cst_8 [0] : vector<16x8xf32> to vector<8xf32>
    %28 = vector.shape_cast %27 : vector<8xf32> to vector<1x8xf32>
    %29 = math.log %28 : vector<1x8xf32>
    %cst_9 = arith.constant 0.000000e+00 : f32
    %30 = vector.broadcast %cst_9 : f32 to vector<16x8xf32>
    %31 = arith.select %21, %16, %30 : vector<16x8xi1>, vector<16x8xf32>
    %cst_10 = arith.constant dense<0.000000e+00> : vector<8xf32>
    %32 = vector.multi_reduction <add>, %31, %cst_10 [0] : vector<16x8xf32> to vector<8xf32>
    %33 = vector.shape_cast %32 : vector<8xf32> to vector<1x8xf32>
    %cst_11 = arith.constant 0.000000e+00 : f32
    %34 = vector.shape_cast %18 : vector<16x1xf32> to vector<16x1xf32>
    %35 = vector.broadcast %34 : vector<16x1xf32> to vector<16x8xf32>
    %36 = vector.broadcast %cst_11 : f32 to vector<16x8xf32>
    %37 = arith.select %21, %35, %36 : vector<16x8xi1>, vector<16x8xf32>
    %cst_12 = arith.constant dense<0.000000e+00> : vector<8xf32>
    %38 = vector.multi_reduction <add>, %37, %cst_12 [0] : vector<16x8xf32> to vector<8xf32>
    %39 = vector.shape_cast %38 : vector<8xf32> to vector<1x8xf32>
    %40 = arith.subf %33, %23 : vector<1x8xf32>
    %41 = arith.subf %40, %29 : vector<1x8xf32>
    %42 = math.exp %41 : vector<1x8xf32>
    %cst_13 = arith.constant 1.000000e+00 : f32
    %43 = vector.broadcast %cst_13 : f32 to vector<1x8xf32>
    %44 = arith.subf %43, %42 : vector<1x8xf32>
    %cst_14 = arith.constant 0.000000e+00 : f32
    %45 = vector.broadcast %cst_14 : f32 to vector<1x8xf32>
    %46 = arith.maximumf %44, %45 : vector<1x8xf32>
    %47 = arith.mulf %46, %46 : vector<1x8xf32>
    %48 = arith.mulf %39, %47 : vector<1x8xf32>
    %49 = arith.mulf %48, %41 : vector<1x8xf32>
    %cst_15 = arith.constant 0.000000e+00 : f32
    %50 = vector.broadcast %cst_15 : f32 to vector<1x8xf32>
    %51 = arith.subf %50, %49 : vector<1x8xf32>
    %c0_16 = arith.constant 0 : index
    %c0_17 = arith.constant 0 : index
    %52 = vector.load %arg5[%c0_16, %c0_17] : memref<1x128xf32, #tpu.memory_space<vmem>>, vector<1x128xf32>
    %53 = vector.shape_cast %51 : vector<1x8xf32> to vector<1x1x8xf32>
    %cst_18 = arith.constant dense<0.000000e+00> : vector<1xf32>
    %54 = vector.multi_reduction <add>, %53, %cst_18 [1, 2] : vector<1x1x8xf32> to vector<1xf32>
    %55 = vector.shape_cast %54 : vector<1xf32> to vector<1x1x1xf32>
    %56 = vector.extract %55[0, 0, 0] : f32 from vector<1x1x1xf32>
    %57 = vector.broadcast %56 : f32 to vector<1x128xf32>
    %58 = arith.addf %52, %57 : vector<1x128xf32>
    %c0_19 = arith.constant 0 : index
    %c0_20 = arith.constant 0 : index
    %59 = vector.load %arg5[%c0_19, %c0_20] : memref<1x128xf32, #tpu.memory_space<vmem>>, vector<1x128xf32>
    tpu.vector_store %arg5[%c0_19, %c0_20], %58 {strides = array<i32>} : memref<1x128xf32, #tpu.memory_space<vmem>>, vector<1x128xf32>,
    return
  }
  func.func @transform_0(%arg0: i32, %arg1: i32) -> (i32, i32) {
    %c1_i32 = arith.constant 1 : i32
    %0 = arith.muli %arg0, %c1_i32 : i32
    %1 = arith.addi %0, %arg1 : i32
    %c0_i32 = arith.constant 0 : i32
    %2 = arith.minsi %1, %c0_i32 : i32
    %c0_i32_0 = arith.constant 0 : i32
    %c0_i32_1 = arith.constant 0 : i32
    return %2, %c0_i32_0 : i32, i32
  }
  func.func @transform_1(%arg0: i32, %arg1: i32) -> (i32, i32) {
    %c1_i32 = arith.constant 1 : i32
    %0 = arith.muli %arg0, %c1_i32 : i32
    %1 = arith.addi %0, %arg1 : i32
    %c0_i32 = arith.constant 0 : i32
    %2 = arith.minsi %1, %c0_i32 : i32
    %c0_i32_0 = arith.constant 0 : i32
    %c0_i32_1 = arith.constant 0 : i32
    return %c0_i32_0, %2 : i32, i32
  }
  func.func @transform_2(%arg0: i32, %arg1: i32) -> (i32, i32) {
    %c0_i32 = arith.constant 0 : i32
    %c0_i32_0 = arith.constant 0 : i32
    %c0_i32_1 = arith.constant 0 : i32
    return %c0_i32, %c0_i32_0 : i32, i32
  }
  func.func @transform_3(%arg0: i32, %arg1: i32) -> (i32, i32) {
    %c0_i32 = arith.constant 0 : i32
    %c0_i32_0 = arith.constant 0 : i32
    return %c0_i32, %arg0 : i32, i32
  }
}

</mosaic_0001>

<bundles_post_ra>
// kernel: tpu_custom_call.1
= control target key start
LH: loop header
LB: loop body
LE: loop exit
PB: predicated region body
PF: predicated region fallthrough
CT: control target
= control target key end

     0   :  { %vm89_vm0 = vcmask 130048   ;;  %v73_v1 = vlaneseq  ;;  %v359_v2 = vmov 0.0   ;;  %s436_s0 = inlined_call_operand.vmem [shape: f32[8,16], index: 0, kind: input, shape index: {}]   ;;  %s437_s1 = inlined_call_operand.vmem [shape: s32[1,8], index: 1, kind: input, shape index: {}]   ;;  %s438_s2 = inlined_call_operand.vmem [shape: f32[16,1], index: 2, kind: input, shape index: {}]   ;;  %s439_s3 = inlined_call_operand.hbm [shape: f32[1,128], index: 3, kind: output, shape index: {}]  }
   0x1   :  { %v72_v0 = vld [vmem:[%s436_s0] sm:$0xff]  ;;  %312 = vmatprep.subr.bf16.mxu0 %v359_v2  ;;  %71 = vst [vmem:[#allocation2] sm:$0x1] %v359_v2  ;;  %306 = vmatprep.subr.bf16.mxu1 %v359_v2 }
   0x2   :  { %v80_v3 = vpack.c.bf16 %v72_v0, %v72_v0  ;;  %v182_v4 = vld [vmem:[%s438_s2] sm:$0xff] }
   0x3   :  { %8 = vsyncpa [#allocation3], 0  ;;  %vm360_vm1 = vmmov 0   ;;  %v389_v5 = vshrl.u32 %v73_v1, 7  ;;  %v77_v6 = vand.u32 127, %v73_v1  ;;  %v361_v9 = vmov 0  }
   0x4   :  { %314 = vmatprep.mubr.msk.bf16.mxu0 %vm360_vm1, %v359_v2  ;;  %308 = vmatprep.mubr.msk.bf16.mxu1 %vm360_vm1, %v359_v2  ;;  %v81_v7 = vunpack.c.l.bf16 %v80_v3  ;;  %v138_v8 = vsel %vm89_vm0, %v80_v3, 0  ;;  %v183_v13 = vld [vmem:[%s438_s2 + $0x8] sm:$0xff]  ;;  %v301_v22 = vld [vmem:[%s437_s1] ss:$0 sm:$0xff]  ;;  %vm190_vm5 = vcmask 64512   ;;  %vm260_vm7 = vcmask 57344  }
   0x5   :  { %326 = vset.pattern.permute.xlu0 %v361_v9  ;;  %313 = vmatpush3.bf16.xpose.msra.mxu0 %v138_v8  ;;  %v393_v10 = vadd.s32 8, %v389_v5  ;;  %vm78_vm2 = vcmp.eq.s32.totalorder %v389_v5, %v77_v6  ;;  %vm188_vm4 = vcmp.eq.s32.totalorder %v389_v5, %v301_v22  ;;  %s362_s1 = smov [#allocation2]  }
   0x6   :  { %230 = vperm.xlu0 %326, %v182_v4   ;;  %v82_v11 = vsub.f32 %v72_v0, %v81_v7  ;;  %v297_v12 = vsel %vm78_vm2, 1.0, %v359_v2  ;;  %s280_s2 = sshll.u32 %s362_s1, 4  ;;  %s281_s2 = int_to_ptr.vmem [resolvable:$true] %s280_s2 }
   0x7   :  { %vm79_vm3 = vcmp.eq.s32.totalorder %v393_v10, %v77_v6  ;;  %vm189_vm6 = vcmp.eq.s32.totalorder %v393_v10, %v301_v22  ;;  %s335_s20 = scalar_lea.vmem %s281_s2, 16  ;;  %s339_s21 = scalar_lea.vmem %s281_s2, 32 }
   0x8   :  { %v83_v14 = vpack.c.bf16 %v82_v11, %v82_v11  ;;  %v298_v15 = vsel %vm79_vm3, 1.0, %v359_v2  ;;  %p336_p0 = scmp.ne.s32.totalorder %s281_s2, %s335_s20  ;;  %p340_p1 = scmp.lt.s32.totalorder %s281_s2, %s281_s2 }
   0x9   :  { %v88_v16 = vpack.c.bf16 %v298_v15, %v297_v12  ;;  %p341_p2 = scmp.lt.s32.totalorder %s339_s21, %s335_s20 }
   0xa   :  { %235 = vperm.xlu0 %326, %v183_v13   ;;  %v94_v17 = vsel %vm89_vm0, %v83_v14, 0 }
   0xb   :  { %307 = vmatpush3.bf16.xpose.msra.mxu1 %v94_v17  ;;  %p342_p3 = por %p341_p2, %p340_p1 }
   0xc   :  { %315 = vmatmul.mubr.msk.bf16.vlgmr.msra.gmra.mrb[0].mxu0 %vm89_vm0, %v88_v16 }
   0xd   :  { %p343_p4 = pnand %p342_p3, %p336_p0 }
  0x12   :  { %309 = vmatmul.mubr.msk.bf16.vlgmr.msra.gmra.mrb[0].mxu1 %vm89_vm0, %v88_v16 }
  0x85   :  { %v231_v62 = vpop.permute.xlu0 %230 }
  0x86   :  { %v238_v3 = vsel %vm188_vm4, %v231_v62, 0.0 }
  0x87   :  { %v240_v6 = vsel %vm190_vm5, %v238_v3, 0.0 }
  0x89   :  { %v236_v2 = vpop.permute.xlu0 %235 }
  0x8a   :  { %v239_v4 = vsel %vm189_vm6, %v236_v2, 0.0 }
  0x8b   :  { %v241_v7 = vsel %vm190_vm5, %v239_v4, 0.0 }
  0x8c   :  { %v242_v8 = vadd.f32 %v241_v7, %v240_v6 }
  0x8e   :  { %v243_v12 = vrot.slane %v242_v8, 4 }
  0x90   :  { %v244_v15 = vadd.f32 %v243_v12, %v242_v8 }
  0x92   :  { %v245_v16 = vrot.slane %v244_v15, 2 }
  0x94   :  { %v246_v17 = vadd.f32 %v245_v16, %v244_v15 }
  0x96   :  { %v247_v5 = vrot.slane %v246_v17, 1 }
  0x98   :  { %v248_v10 = vadd.f32 %v247_v5, %v246_v17 }
  0xdf   :  { %v174_v18 = vpop.f32.mrb[0].mxu0 }
  0xe0   :  { %v316_v19 = vpop.f32.mrb[1].mxu0 }
  0xe1   :  { %v177_v20 = vpop.f32.mrb[2].mxu0 }
  0xe2   :  { %v317_v21 = vpop.f32.mrb[3].mxu0 }
  0xe5   :  { %v130_v23 = vpop.f32.mrb[0].mxu1 }
  0xe6   :  { %v175_v24 = vadd.f32 %v174_v18, %v130_v23  ;;  %v310_v25 = vpop.f32.mrb[1].mxu1 }
  0xe7   :  { %v133_v26 = vpop.f32.mrb[2].mxu1 }
  0xe8   :  { %v178_v27 = vadd.f32 %v177_v20, %v133_v26  ;;  %v311_v28 = vpop.f32.mrb[3].mxu1  ;;  %v217_v29 = vsel %vm188_vm4, %v175_v24, 0.0  ;;  %v191_v30 = vsel %vm190_vm5, %v175_v24, -inf }
  0xe9   :  { %v219_v34 = vsel %vm190_vm5, %v217_v29, 0.0 }
  0xea   :  { %v192_v31 = vsel %vm190_vm5, %v178_v27, -inf  ;;  %v218_v32 = vsel %vm189_vm6, %v178_v27, 0.0 }
  0xeb   :  { %v193_v33 = vmax.f32 %v191_v30, %v192_v31  ;;  %v220_v35 = vsel %vm190_vm5, %v218_v32, 0.0 }
  0xec   :  { %v221_v36 = vadd.f32 %v220_v35, %v219_v34 }
  0xed   :  { %v194_v37 = vrot.slane %v193_v33, 4 }
  0xee   :  { %v222_v38 = vrot.slane %v221_v36, 4 }
  0xef   :  { %v195_v39 = vmax.f32 %v193_v33, %v194_v37  ;;  %v259_v33 = vld [vmem:[#allocation2] sm:$0x1] }
  0xf0   :  { %v223_v40 = vadd.f32 %v222_v38, %v221_v36 }
  0xf1   :  { %v196_v41 = vrot.slane %v195_v39, 2 }
  0xf2   :  { %v224_v42 = vrot.slane %v223_v40, 2 }
  0xf3   :  { %v197_v43 = vmax.f32 %v195_v39, %v196_v41 }
  0xf4   :  { %v225_v44 = vadd.f32 %v224_v42, %v223_v40 }
  0xf5   :  { %v198_v45 = vrot.slane %v197_v43, 1 }
  0xf6   :  { %v226_v46 = vrot.slane %v225_v44, 1 }
  0xf7   :  { %v199_v47 = vmax.f32 %v197_v43, %v198_v45 }
  0xf8   :  { %v227_v48 = vadd.f32 %v226_v46, %v225_v44 }
  0xf9   :  { %v200_v49 = vsub.f32 %v175_v24, %v199_v47  ;;  %v201_v50 = vsub.f32 %v178_v27, %v199_v47 }
  0xfa   :  { %v249_v51 = vsub.f32 %v227_v48, %v199_v47 }
  0xfb   :  { %v202_v52 = vmul.f32 1.442695, %v200_v49  ;;  %v204_v53 = vmul.f32 1.442695, %v201_v50 }
  0xfd   :  { %327 = vpow2.f32 %v202_v52 }
  0xfe   :  { %329 = vpow2.f32 %v204_v53 }
 0x107   :  { %v328_v54 = vpop.eup %327 }
 0x108   :  { %v330_v55 = vpop.eup %329  ;;  %v206_v56 = vsel %vm190_vm5, %v328_v54, 0.0 }
 0x109   :  { %v207_v57 = vsel %vm190_vm5, %v330_v55, 0.0 }
 0x10a   :  { %v208_v58 = vadd.f32 %v207_v57, %v206_v56 }
 0x10c   :  { %v209_v59 = vrot.slane %v208_v58, 4 }
 0x10e   :  { %v210_v60 = vadd.f32 %v209_v59, %v208_v58 }
 0x110   :  { %v211_v61 = vrot.slane %v210_v60, 2 }
 0x112   :  { %v212_v63 = vadd.f32 %v211_v61, %v210_v60 }
 0x114   :  { %v213_v0 = vrot.slane %v212_v63, 1 }
 0x116   :  { %v214_v1 = vadd.f32 %v213_v0, %v212_v63 }
 0x118   :  { %331 = vlog2.f32 %v214_v1 }
 0x122   :  { %v332_v9 = vpop.eup %331 }
 0x123   :  { %v216_v11 = vmul.f32 0.6931472, %v332_v9 }
 0x125   :  { %v250_v13 = vsub.f32 %v249_v51, %v216_v11 }
 0x127   :  { %v251_v14 = vmul.f32 1.442695, %v250_v13 }
 0x129   :  { %333 = vpow2.f32 %v251_v14 }
 0x133   :  { %v334_v18 = vpop.eup %333 }
 0x134   :  { %v253_v19 = vsub.f32 1.0, %v334_v18 }
 0x136   :  { %v254_v20 = vmax.f32 %v253_v19, 0.0 }
 0x138   :  { %v255_v21 = vmul.f32 %v254_v20, %v254_v20 }
 0x13a   :  { %v256_v22 = vmul.f32 %v255_v21, %v248_v10 }
 0x13c   :  { %v257_v23 = vmul.f32 %v256_v22, %v250_v13 }
 0x13e   :  { %v258_v24 = vsub.f32 0.0, %v257_v23 }
 0x140   :  { %v261_v25 = vsel %vm260_vm7, %v258_v24, 0.0 }
 0x141   :  { %262 = vadd.xlane.f32.xlu1 %v261_v25 }
 0x1ce   :  { %v263_v26 = vpop.xlane.xlu1 %262 }
 0x1cf   :  { %v264_v27 = vrot.slane %v263_v26, 4 }
 0x1d1   :  { %v265_v28 = vadd.f32 %v264_v27, %v263_v26 }
 0x1d3   :  { %v266_v29 = vrot.slane %v265_v28, 2 }
 0x1d5   :  { %v267_v30 = vadd.f32 %v266_v29, %v265_v28 }
 0x1d7   :  { %v268_v31 = vrot.slane %v267_v30, 1 }
 0x1d9   :  { %v269_v32 = vadd.f32 %v268_v31, %v267_v30 }
 0x1db   :  { %320 = vpush %v269_v32 }
 0x20c   :  { %s321_s19 = spop %320 }
 0x20d   :  { %v271_v34 = vstv %s321_s19 }
 0x20e   :  { %v272_v35 = vadd.f32 %v271_v34, %v259_v33 }
 0x210   :  { %273 = vst [vmem:[#allocation2] sm:$0x1] %v272_v35 }
 0x211   :  { %346 = shalt.err (!%p343_p4)
}
 0x212   :  { %s347_s24 = scalar_lea.hbm %s439_s3, 16 }
 0x213   :  { %p348_p5 = scmp.ne.s32.totalorder %s439_s3, %s347_s24  ;;  %p351_p6 = scmp.lt.u32.totalorder %s347_s24, %s439_s3 }
 0x215   :  { %p353_p7 = pnand %p351_p6, %p348_p5 }
 0x217   :  { %356 = shalt.err (!%p353_p7)
}
 0x218   :  { %283 = dma.vmem_to_hbm [thread:$0]  %s281_s2, 16, %s439_s3, [#allocation3]  }
 0x219   :  { %357 = dma.done.wait [#allocation3], 16  }
 0x21a   :  { %358 = vsyncadd [#allocation3], 4294967280 }
 0x21b   :  { %287 = vsyncpa [#allocation3], 1 }

</bundles_post_ra>
